<compile_context>
chip_gen: v6e
topology: v6e:2x2x1
jax: 0.10.0
libtpu: 0.0.40
codegen_flags: <defaults>
</compile_context>

<pallas_src>
import functools

import jax
import jax.numpy as jnp
from jax.experimental import pallas as pl
from jax.experimental.pallas import tpu as pltpu

EPS = 1e-5


# --------------------------------------------------------------------------- #
# Small helpers
# --------------------------------------------------------------------------- #
def _vmem_limit_bytes():
    """~3/4 of per-core VMEM, clamped to [32, 64] MiB (safe on v5e/v6e/v7x)."""
    cap = 64 * 1024 * 1024
    try:
        cap = int(pltpu.get_tpu_info().vmem_capacity_bytes)
    except Exception:
        pass
    return max(32 * 1024 * 1024, min(cap * 3 // 4, 64 * 1024 * 1024))


def _maybe_buffered(block_shape, index_map, nbuf):
    """BlockSpec with deeper pipelining when supported; plain spec otherwise."""
    if nbuf > 2 and hasattr(pl, "Buffered"):
        try:
            return pl.BlockSpec(block_shape, index_map,
                                pipeline_mode=pl.Buffered(nbuf))
        except TypeError:
            pass
    return pl.BlockSpec(block_shape, index_map)


def _plan_row_tiling(mf, hf, target_bytes):
    """Pick (tile_rows, pad_rows).

    tile_rows is a multiple of 8 that divides mf + pad_rows (or the full extent)
    with an f32 footprint near target_bytes, so blocks never blow past the VMEM
    limit and the per-step DMA stays in the 85%+ roofline band.
    """
    row_bytes = hf * 4
    target_rows = max(8, (target_bytes // row_bytes) // 8 * 8)
    if mf <= target_rows:
        return mf, 0
    best = 0
    d = 1
    while d * d <= mf:
        if mf % d == 0:
            for cand in (d, mf // d):
                if cand % 8 == 0 and cand <= target_rows and cand > best:
                    best = cand
        d += 1
    if best * 4 >= target_rows:          # a divisor within 4x of target: no pad
        return best, 0
    # Otherwise pad with zero rows (stats use the true count, so still exact).
    return target_rows, (-mf) % target_rows


# --------------------------------------------------------------------------- #
# Shared in-kernel math
# --------------------------------------------------------------------------- #
def _regroup_fold(v, g, h):
    """(1, g*h) per-lane sums -> per-channel sums tiled back to (1, g*h).

    With the fold layout, lane j holds channel j % h.  Exact f32 adds on tiny
    (1, h) lane slices (no MXU rounding), essentially free XLU/VPU filler.
    """
    tot = v[:, 0:h]
    for a in range(1, g):
        tot = tot + v[:, a * h:(a + 1) * h]
    return jnp.concatenate([tot] * g, axis=1)


def _scale_shift(colsum, colsumsq, gamma, beta, g, h, count, eps):
    """Fold mean/var/gamma/beta into per-lane scale/shift: y = x*scale + shift."""
    if g > 1:
        ch_sum = _regroup_fold(colsum, g, h)
        ch_sumsq = _regroup_fold(colsumsq, g, h)
    else:
        ch_sum, ch_sumsq = colsum, colsumsq
    inv_n = 1.0 / count
    mean = ch_sum * inv_n
    # TODO(synk): for extreme per-channel means switch to a pivoted/centred
    # variance; the clamp below only prevents NaNs from cancellation.
    var = jnp.maximum(ch_sumsq * inv_n - mean * mean, 0.0)
    inv_std = jax.lax.rsqrt(var + eps)
    scale = gamma * inv_std
    shift = beta - mean * scale
    return scale, shift


# --------------------------------------------------------------------------- #
# Kernels
# --------------------------------------------------------------------------- #
def _make_fused_kernel(count, eps, g, h):
    """Single-pass kernel: whole (Mf, Hf) slab resident in VMEM."""
    def kernel(x_ref, gamma_ref, beta_ref, o_ref):
        xf = x_ref[...].astype(jnp.float32)
        colsum = jnp.sum(xf, axis=0, keepdims=True)
        colsumsq = jnp.sum(xf * xf, axis=0, keepdims=True)
        scale, shift = _scale_shift(colsum, colsumsq, gamma_ref[...],
                                    beta_ref[...], g, h, count, eps)
        o_ref[...] = (xf * scale + shift).astype(o_ref.dtype)
    return kernel


def _make_stats_kernel(nt, per_split, use_mxu):
    """Pass 1: accumulate per-lane sum / sum-of-squares partials per grid slice."""
    def kernel(x_ref, sum_ref, sumsq_ref):
        i = pl.program_id(1)

        @pl.when(i == 0)
        def _():
            sum_ref[...] = jnp.zeros_like(sum_ref)
            sumsq_ref[...] = jnp.zeros_like(sumsq_ref)

        tile_idx = pl.program_id(0) * per_split + i

        # The tail iteration of an odd tile count re-reads a clamped duplicate
        # tile; this guard keeps it out of the statistics.
        @pl.when(tile_idx < nt)
        def _():
            x = x_ref[...]
            if use_mxu:
                # Sub-f32 inputs: do the column sums on the otherwise idle MXU
                # (ones-vector contraction, f32 accumulate) so the 4 VALU slots
                # stay off the critical path (v7x bf16 would be VPU-bound).
                ones = jnp.ones((1, x.shape[0]), x.dtype)
                colsum = jnp.dot(ones, x, preferred_element_type=jnp.float32)
                colsumsq = jnp.dot(ones, x * x,
                                   preferred_element_type=jnp.float32)
            else:
                xf = x.astype(jnp.float32)
                colsum = jnp.sum(xf, axis=0, keepdims=True)
                colsumsq = jnp.sum(xf * xf, axis=0, keepdims=True)
            sum_ref[...] += colsum[None]
            sumsq_ref[...] += colsumsq[None]
    return kernel


def _make_affine_kernel(count, eps, g, h):
    """Pass 2: y = x*scale + shift, with the prologue folded in.

    scale/shift are recomputed every step from the tiny VMEM-resident partials
    (XLU/EUP filler under the memory bound).  Unlike a scratch gated on
    pl.when(program_id == 0), this stays correct when the grid axis is split
    across TensorCores.
    """
    def kernel(x_ref, sum_ref, sumsq_ref, gamma_ref, beta_ref, o_ref):
        colsum = jnp.sum(sum_ref[...], axis=0)          # (nsplit,1,Hf) -> (1,Hf)
        colsumsq = jnp.sum(sumsq_ref[...], axis=0)
        scale, shift = _scale_shift(colsum, colsumsq, gamma_ref[...],
                                    beta_ref[...], g, h, count, eps)
        o_ref[...] = (x_ref[...].astype(jnp.float32) * scale
                      + shift).astype(o_ref.dtype)
    return kernel


# --------------------------------------------------------------------------- #
# Wrapper
# --------------------------------------------------------------------------- #
def batch_norm_node(x, gamma, beta, *, eps=EPS, single_pass=None,
                    tile_rows=None, target_tile_bytes=None):
    """SGCN BatchNormNode forward. x: (B, N, H); gamma/beta: (H,) -> (B, N, H)."""
    B, N, H = x.shape
    M = B * N
    out_dtype = x.dtype
    itemsize = jnp.dtype(x.dtype).itemsize

    # Lane-dense folding (pure reshape): pack g rows per folded row so every
    # lane is used and output stores are unmasked full vregs.
    g = 128 // H if (H < 128 and 128 % H == 0) else 1
    # TODO(synk): generalize lane packing to H that does not divide 128 via an
    # lcm(H, 128)-periodic flat layout; such H currently keeps Hf = H (partially
    # masked lane stores on the ragged part).
    Hf = H * g
    Mf_min = -(-M // g)

    vmem_limit = _vmem_limit_bytes()
    if target_tile_bytes is None:
        target_tile_bytes = max(2 * 1024 * 1024, vmem_limit // 12)

    if single_pass is None:
        # x + y + ~3 f32-wide in-kernel temporaries must fit comfortably.
        fused_bytes = Mf_min * Hf * (2 * itemsize + 12)
        single_pass = fused_bytes <= (vmem_limit * 3) // 4

    if single_pass:
        tile, pad_rows = Mf_min, 0
    elif tile_rows is not None:
        tile = int(tile_rows)
        if tile >= Mf_min:
            tile, pad_rows = Mf_min, 0
        else:
            assert tile % 8 == 0, "tile_rows must be a multiple of 8"
            pad_rows = (-Mf_min) % tile
    else:
        tile, pad_rows = _plan_row_tiling(Mf_min, Hf, target_tile_bytes)

    Mf = Mf_min + pad_rows
    Mp = Mf * g

    x2d = x.reshape(M, H)
    if Mp != M:  # zero rows: the statistics divide by the true count M => exact
        x2d = jnp.pad(x2d, ((0, Mp - M), (0, 0)))
    xf = x2d.reshape(Mf, Hf)

    gamma_f = jnp.tile(gamma.astype(jnp.float32), g).reshape(1, Hf)
    beta_f = jnp.tile(beta.astype(jnp.float32), g).reshape(1, Hf)
    count = float(M)

    if single_pass:
        # One launch, one HBM read + one write; stats + affine fused in VMEM.
        yf = pl.pallas_call(
            _make_fused_kernel(count, eps, g, H),
            out_shape=jax.ShapeDtypeStruct((Mf, Hf), out_dtype),
            compiler_params=pltpu.CompilerParams(vmem_limit_bytes=vmem_limit),
        )(xf, gamma_f, beta_f)
    else:
        nt = Mf // tile
        nsplit = 2 if nt >= 2 else 1         # both v7x TensorCores stream pass 1
        per_split = -(-nt // nsplit)
        nbuf1 = 3 if per_split >= 4 else 2
        nbuf2 = 3 if nt >= 4 else 2
        use_mxu = itemsize < 4               # bf16/fp16: sums on the idle MXU

        def x_map(s, i):
            # Clamped so the tail iteration of an odd tile count stays in
            # bounds; the kernel's pl.when guard keeps it out of the stats.
            return (jnp.minimum(s * per_split + i, nt - 1), 0)

        # ---- Pass 1: per-lane sum / sum-of-squares partials ----------------
        sums, sumsqs = pl.pallas_call(
            _make_stats_kernel(nt, per_split, use_mxu),
            out_shape=(jax.ShapeDtypeStruct((nsplit, 1, Hf), jnp.float32),
                       jax.ShapeDtypeStruct((nsplit, 1, Hf), jnp.float32)),
            grid_spec=pltpu.PrefetchScalarGridSpec(
                num_scalar_prefetch=0,
                grid=(nsplit, per_split),
                in_specs=[_maybe_buffered((tile, Hf), x_map, nbuf1)],
                out_specs=[pl.BlockSpec((1, 1, Hf), lambda s, i: (s, 0, 0)),
                           pl.BlockSpec((1, 1, Hf), lambda s, i: (s, 0, 0))],
            ),
            compiler_params=pltpu.CompilerParams(
                dimension_semantics=("parallel", "arbitrary"),
                vmem_limit_bytes=vmem_limit),
        )(xf)

        # ---- Pass 2: streaming y = x*scale + shift (prologue folded in) ----
        yf = pl.pallas_call(
            _make_affine_kernel(count, eps, g, H),
            out_shape=jax.ShapeDtypeStruct((Mf, Hf), out_dtype),
            grid_spec=pltpu.PrefetchScalarGridSpec(
                num_scalar_prefetch=0,
                grid=(nt,),
                in_specs=[_maybe_buffered((tile, Hf), lambda i: (i, 0), nbuf2),
                          pl.BlockSpec((nsplit, 1, Hf), lambda i: (0, 0, 0)),
                          pl.BlockSpec((nsplit, 1, Hf), lambda i: (0, 0, 0)),
                          pl.BlockSpec((1, Hf), lambda i: (0, 0)),
                          pl.BlockSpec((1, Hf), lambda i: (0, 0))],
                out_specs=pl.BlockSpec((tile, Hf), lambda i: (i, 0)),
            ),
            compiler_params=pltpu.CompilerParams(
                dimension_semantics=("parallel",),
                vmem_limit_bytes=vmem_limit),
        )(xf, sums, sumsqs, gamma_f, beta_f)

    y2d = yf.reshape(Mp, H)
    if Mp != M:
        y2d = y2d[:M]
    return y2d.reshape(B, N, H)


# --------------------------------------------------------------------------- #
# Reference + tests
# --------------------------------------------------------------------------- #
def _reference(x, gamma, beta, eps=EPS):
    # Pure-JAX mirror of nn.BatchNorm1d(track_running_stats=False) applied on
    # the transposed layout (i.e. stats over the (B, N) axes per channel).
    mean = jnp.mean(x, axis=(0, 1), keepdims=True)
    var = jnp.mean((x - mean) ** 2, axis=(0, 1), keepdims=True)
    return (x - mean) * jax.lax.rsqrt(var + eps) * gamma + beta


if __name__ == "__main__":
    key = jax.random.PRNGKey(0)
    kx, kg, kb = jax.random.split(key, 3)

    def check(name, x, gamma, beta, tol, **kw):
        fn = jax.jit(functools.partial(batch_norm_node, **kw))
        y = jax.block_until_ready(fn(x, gamma, beta))
        y_ref = _reference(x.astype(jnp.float32), gamma.astype(jnp.float32),
                           beta.astype(jnp.float32))
        err = jnp.max(jnp.abs(y.astype(jnp.float32) - y_ref))
        assert err < tol, f"{name}: mismatch vs reference: {err}"

    # (a) Canonical small SGCN shape -> fused single-pass VMEM path.
    B, N, H = 2, 8, 32
    x = jax.random.normal(kx, (B, N, H), dtype=jnp.float32)
    gamma = 1.0 + 0.1 * jax.random.normal(kg, (H,), dtype=jnp.float32)
    beta = 0.1 * jax.random.normal(kb, (H,), dtype=jnp.float32)
    check("fused_f32", x, gamma, beta, 1e-4)

    # (b) Forced two-pass f32: odd tile count exercises the megacore split
    #     clamp/guard, tile_rows=40 exercises zero-row padding for tiling.
    x2 = jax.random.normal(kx, (4, 96, 32), dtype=jnp.float32)
    check("two_pass_f32", x2, gamma, beta, 1e-4,
          single_pass=False, tile_rows=40)

    # (c) Forced two-pass bf16: exercises the MXU stats reduction path.
    check("two_pass_bf16", x2.astype(jnp.bfloat16), gamma, beta, 5e-2,
          single_pass=False, tile_rows=32)

    # (d) H that does not divide 128 (no lane folding, masked-lane fallback).
    x3 = jax.random.normal(kx, (3, 10, 40), dtype=jnp.float32)
    g3 = 1.0 + 0.1 * jax.random.normal(kg, (40,), dtype=jnp.float32)
    b3 = 0.1 * jax.random.normal(kb, (40,), dtype=jnp.float32)
    check("nofold_f32", x3, g3, b3, 1e-4)

    # (e) M not divisible by the fold factor -> zero-row padding path.
    x4 = jax.random.normal(kx, (2, 9, 32), dtype=jnp.float32)
    check("foldpad_f32", x4, gamma, beta, 1e-4)

    print("KERNEL_OK")
</pallas_src>

<mosaic_0001>
module attributes {stable_mosaic.version = 11 : i64} {
  func.func @kernel(%arg0: memref<4x128xf32, #tpu.memory_space<vmem>>, %arg1: memref<1x128xf32, #tpu.memory_space<vmem>>, %arg2: memref<1x128xf32, #tpu.memory_space<vmem>>, %arg3: memref<4x128xf32, #tpu.memory_space<vmem>>) attributes {dimension_semantics = [], scalar_prefetch = 0 : i64, scratch_operands = 0 : i64, tpu.core_type = #tpu.core_type<tc>} {
    %c0 = arith.constant 0 : index
    %c0_0 = arith.constant 0 : index
    %0 = vector.load %arg0[%c0, %c0_0] : memref<4x128xf32, #tpu.memory_space<vmem>>, vector<4x128xf32>
    %cst = arith.constant dense<0.000000e+00> : vector<128xf32>
    %1 = vector.multi_reduction <add>, %0, %cst [0] : vector<4x128xf32> to vector<128xf32>
    %2 = vector.shape_cast %1 : vector<128xf32> to vector<1x128xf32>
    %3 = arith.mulf %0, %0 : vector<4x128xf32>
    %cst_1 = arith.constant dense<0.000000e+00> : vector<128xf32>
    %4 = vector.multi_reduction <add>, %3, %cst_1 [0] : vector<4x128xf32> to vector<128xf32>
    %5 = vector.shape_cast %4 : vector<128xf32> to vector<1x128xf32>
    %c0_2 = arith.constant 0 : index
    %c0_3 = arith.constant 0 : index
    %6 = vector.load %arg1[%c0_2, %c0_3] : memref<1x128xf32, #tpu.memory_space<vmem>>, vector<1x128xf32>
    %c0_4 = arith.constant 0 : index
    %c0_5 = arith.constant 0 : index
    %7 = vector.load %arg2[%c0_4, %c0_5] : memref<1x128xf32, #tpu.memory_space<vmem>>, vector<1x128xf32>
    %8 = vector.extract_strided_slice %2 {offsets = [0, 0], sizes = [1, 32], strides = [1, 1]} : vector<1x128xf32> to vector<1x32xf32>
    %9 = vector.extract_strided_slice %2 {offsets = [0, 32], sizes = [1, 32], strides = [1, 1]} : vector<1x128xf32> to vector<1x32xf32>
    %10 = arith.addf %8, %9 : vector<1x32xf32>
    %11 = vector.extract_strided_slice %2 {offsets = [0, 64], sizes = [1, 32], strides = [1, 1]} : vector<1x128xf32> to vector<1x32xf32>
    %12 = arith.addf %10, %11 : vector<1x32xf32>
    %13 = vector.extract_strided_slice %2 {offsets = [0, 96], sizes = [1, 32], strides = [1, 1]} : vector<1x128xf32> to vector<1x32xf32>
    %14 = arith.addf %12, %13 : vector<1x32xf32>
    %15 = tpu.concatenate %14, %14, %14, %14 in 1 : vector<1x32xf32>, vector<1x32xf32>, vector<1x32xf32>, vector<1x32xf32> -> vector<1x128xf32>
    %16 = vector.extract_strided_slice %5 {offsets = [0, 0], sizes = [1, 32], strides = [1, 1]} : vector<1x128xf32> to vector<1x32xf32>
    %17 = vector.extract_strided_slice %5 {offsets = [0, 32], sizes = [1, 32], strides = [1, 1]} : vector<1x128xf32> to vector<1x32xf32>
    %18 = arith.addf %16, %17 : vector<1x32xf32>
    %19 = vector.extract_strided_slice %5 {offsets = [0, 64], sizes = [1, 32], strides = [1, 1]} : vector<1x128xf32> to vector<1x32xf32>
    %20 = arith.addf %18, %19 : vector<1x32xf32>
    %21 = vector.extract_strided_slice %5 {offsets = [0, 96], sizes = [1, 32], strides = [1, 1]} : vector<1x128xf32> to vector<1x32xf32>
    %22 = arith.addf %20, %21 : vector<1x32xf32>
    %23 = tpu.concatenate %22, %22, %22, %22 in 1 : vector<1x32xf32>, vector<1x32xf32>, vector<1x32xf32>, vector<1x32xf32> -> vector<1x128xf32>
    %cst_6 = arith.constant 6.250000e-02 : f32
    %24 = vector.broadcast %cst_6 : f32 to vector<1x128xf32>
    %25 = arith.mulf %15, %24 : vector<1x128xf32>
    %cst_7 = arith.constant 6.250000e-02 : f32
    %26 = vector.broadcast %cst_7 : f32 to vector<1x128xf32>
    %27 = arith.mulf %23, %26 : vector<1x128xf32>
    %28 = arith.mulf %25, %25 : vector<1x128xf32>
    %29 = arith.subf %27, %28 : vector<1x128xf32>
    %cst_8 = arith.constant 0.000000e+00 : f32
    %30 = vector.broadcast %cst_8 : f32 to vector<1x128xf32>
    %31 = arith.maximumf %29, %30 : vector<1x128xf32>
    %cst_9 = arith.constant 9.99999974E-6 : f32
    %32 = vector.broadcast %cst_9 : f32 to vector<1x128xf32>
    %33 = arith.addf %31, %32 : vector<1x128xf32>
    %34 = math.rsqrt %33 : vector<1x128xf32>
    %35 = arith.mulf %6, %34 : vector<1x128xf32>
    %36 = arith.mulf %25, %35 : vector<1x128xf32>
    %37 = arith.subf %7, %36 : vector<1x128xf32>
    %38 = vector.broadcast %35 : vector<1x128xf32> to vector<4x128xf32>
    %39 = arith.mulf %0, %38 : vector<4x128xf32>
    %40 = vector.broadcast %37 : vector<1x128xf32> to vector<4x128xf32>
    %41 = arith.addf %39, %40 : vector<4x128xf32>
    %c0_10 = arith.constant 0 : index
    %c0_11 = arith.constant 0 : index
    %42 = vector.load %arg3[%c0_10, %c0_11] : memref<4x128xf32, #tpu.memory_space<vmem>>, vector<4x128xf32>
    tpu.vector_store %arg3[%c0_10, %c0_11], %41 {strides = array<i32>} : memref<4x128xf32, #tpu.memory_space<vmem>>, vector<4x128xf32>,
    return
  }
}

</mosaic_0001>

<bundles_post_ra>
// kernel: tile.14
= control target key start
LH: loop header
LB: loop body
LE: loop exit
PB: predicated region body
PF: predicated region fallthrough
CT: control target
= control target key end

     0   :  { %vm8_vm0 = vcmask 261120   ;;  %s40_s8 = smov 32   ;;  %s41_s9 = smov 64   ;;  %vm14_vm1 = vcmask 1048320   ;;  %vm20_vm2 = vcmask 785920   ;;  %vm26_vm3 = vcmask 523520   ;;  %s58_s0 = inlined_call_operand.vmem [shape: f32[4,32], index: 0, kind: input, shape index: {}]   ;;  %s59_s1 = inlined_call_operand.vmem [shape: f32[1,128], index: 1, kind: output, shape index: {}]  }
   0x1   :  { %v5_v0 = vld [vmem:[%s58_s0] sm:$0xf]  ;;  %s39_s0 = smov 96  }
   0x2   :  { %6 = vst [vmem:[#allocation1] sm:$0xf] %v5_v0 }
   0x9   :  { %v11_v1 = vld [vmem:[#allocation1 + $0x3] sm:$0x1]   ;;  %v23_v2 = vld [vmem:[#allocation1 + $0x1] sm:$0x1]   ;;  %v7_v3 = vld [vmem:[#allocation1] sm:$0x1]  }
   0xa   :  { %12 = vrot.lane.b32.xlu0 %v11_v1, %s39_s0  ;;  %24 = vrot.lane.b32.xlu1 %v23_v2, %s40_s8  ;;  %v17_v4 = vld [vmem:[#allocation1 + $0x2] sm:$0x1]   ;;  %9 = vst.msk [vmem:[#allocation0] sm:$0x1] %vm8_vm0, %v7_v3  }
   0xe   :  { %18 = vrot.lane.b32.xlu0 %v17_v4, %s41_s9 }
  0x7c   :  { %v13_v5 = vpop.permute.xlu0 %12   ;;  %v25_v6 = vpop.permute.xlu1 %24  }
  0x7d   :  { %15 = vst.msk [vmem:[#allocation0] sm:$0x1] %vm14_vm1, %v13_v5  }
  0x80   :  { %v19_v7 = vpop.permute.xlu0 %18  }
  0x81   :  { %21 = vst.msk [vmem:[#allocation0] sm:$0x1] %vm20_vm2, %v19_v7  }
  0x82   :  { %27 = vst.msk [vmem:[#allocation0] sm:$0x1] %vm26_vm3, %v25_v6  }
  0x89   :  { %v32_v8 = vld [vmem:[#allocation0] sm:$0x1] }
  0x8a   :  { %35 = vst [vmem:[%s59_s1] sm:$0x1] %v32_v8 }

// kernel: tile.13
= control target key start
LH: loop header
LB: loop body
LE: loop exit
PB: predicated region body
PF: predicated region fallthrough
CT: control target
= control target key end

     0   :  { %s22_s0 = inlined_call_operand.vmem [shape: f32[32], index: 0, kind: input, shape index: {}]   ;;  %s23_s1 = inlined_call_operand.vmem [shape: f32[4,32], index: 1, kind: output, shape index: {}]  }
   0x1   :  { %v4_v0 = vld [vmem:[%s22_s0] ss:$0 sm:$0xff] }
   0x2   :  { %5 = vst [vmem:[%s23_s1] sm:$0xf] %v4_v0 }

// kernel: batch_norm_node.1
= control target key start
LH: loop header
LB: loop body
LE: loop exit
PB: predicated region body
PF: predicated region fallthrough
CT: control target
= control target key end

     0   :  { %vm15_vm0 = vcmask 1043456   ;;  %s122_s14 = smov 96   ;;  %s124_s15 = smov 64   ;;  %vm56_vm1 = vcmask 261120   ;;  %vm58_vm2 = vcmask 523264   ;;  %vm60_vm3 = vcmask 785408   ;;  %s163_s0 = inlined_call_operand.vmem [shape: f32[4,128], index: 0, kind: input, shape index: {}]   ;;  %s164_s1 = inlined_call_operand.vmem [shape: f32[1,128], index: 1, kind: input, shape index: {}]   ;;  %s165_s2 = inlined_call_operand.vmem [shape: f32[1,128], index: 2, kind: input, shape index: {}]   ;;  %s166_s3 = inlined_call_operand.vmem [shape: f32[4,128], index: 3, kind: output, shape index: {}]  }
   0x1   :  { %v148_v0 = vld [vmem:[%s163_s0] sm:$0xf]  ;;  %s123_s0 = smov 32   ;;  %v99_v46 = vlaneseq }
   0x2   :  { %v16_v1 = vsel %vm15_vm0, %v148_v0, 0.0  ;;  %v23_v2 = vmul.f32 %v148_v0, %v148_v0  ;;  %v31_v48 = vld [vmem:[%s164_s1] sm:$0x1] }
   0x3   :  { %v17_v3 = vrot.slane %v16_v1, 4  ;;  %v100_v47 = vshrl.u32 %v99_v46, 7  ;;  %v32_v52 = vld [vmem:[%s165_s2] sm:$0x1] }
   0x4   :  { %v24_v4 = vsel %vm15_vm0, %v23_v2, 0.0 }
   0x5   :  { %v18_v5 = vadd.f32 %v17_v3, %v16_v1  ;;  %v25_v6 = vrot.slane %v24_v4, 4  ;;  %v101_v49 = vsub.s32 0, %v100_v47 }
   0x7   :  { %v19_v7 = vrot.slane %v18_v5, 2  ;;  %v26_v8 = vadd.f32 %v25_v6, %v24_v4 }
   0x9   :  { %v20_v9 = vadd.f32 %v19_v7, %v18_v5  ;;  %v27_v10 = vrot.slane %v26_v8, 2 }
   0xb   :  { %v21_v11 = vrot.slane %v20_v9, 1  ;;  %v28_v12 = vadd.f32 %v27_v10, %v26_v8 }
   0xd   :  { %v22_v13 = vadd.f32 %v21_v11, %v20_v9  ;;  %v29_v14 = vrot.slane %v28_v12, 1 }
   0xf   :  { %34 = vrot.lane.b32.xlu0 %v22_v13, %s122_s14  ;;  %42 = vrot.lane.b32.xlu1 %v22_v13, %s123_s0  ;;  %v30_v15 = vadd.f32 %v29_v14, %v28_v12 }
  0x13   :  { %38 = vrot.lane.b32.xlu0 %v22_v13, %s124_s15  ;;  %63 = vrot.lane.b32.xlu1 %v30_v15, %s122_s14 }
  0x17   :  { %67 = vrot.lane.b32.xlu0 %v30_v15, %s124_s15  ;;  %71 = vrot.lane.b32.xlu1 %v30_v15, %s123_s0 }
  0x81   :  { %v35_v16 = vpop.permute.xlu0 %34  ;;  %v43_v17 = vpop.permute.xlu1 %42 }
  0x82   :  { %v37_v18 = vadd.f32 %v35_v16, %v22_v13 }
  0x85   :  { %v39_v19 = vpop.permute.xlu0 %38  ;;  %v64_v20 = vpop.permute.xlu1 %63 }
  0x86   :  { %v41_v21 = vadd.f32 %v39_v19, %v37_v18  ;;  %v66_v22 = vadd.f32 %v64_v20, %v30_v15 }
  0x88   :  { %v45_v23 = vadd.f32 %v43_v17, %v41_v21 }
  0x89   :  { %v68_v24 = vpop.permute.xlu0 %67  ;;  %v72_v25 = vpop.permute.xlu1 %71 }
  0x8a   :  { %v70_v26 = vadd.f32 %v68_v24, %v66_v22  ;;  %50 = vrot.lane.b32.xlu1 %v45_v23, %s124_s15  ;;  %47 = vrot.lane.b32.xlu0 %v45_v23, %s123_s0 }
  0x8c   :  { %v74_v27 = vadd.f32 %v72_v25, %v70_v26 }
  0x8e   :  { %53 = vrot.lane.b32.xlu0 %v45_v23, %s122_s14  ;;  %76 = vrot.lane.b32.xlu1 %v74_v27, %s123_s0 }
  0x92   :  { %79 = vrot.lane.b32.xlu0 %v74_v27, %s124_s15  ;;  %82 = vrot.lane.b32.xlu1 %v74_v27, %s122_s14 }
  0xfc   :  { %v51_v28 = vpop.permute.xlu1 %50  ;;  %v48_v29 = vpop.permute.xlu0 %47 }
  0xfd   :  { %v57_v30 = vsel %vm56_vm1, %v45_v23, %v48_v29 }
  0xfe   :  { %v59_v32 = vsel %vm58_vm2, %v57_v30, %v51_v28 }
 0x100   :  { %v77_v31 = vpop.permute.xlu1 %76  ;;  %v54_v33 = vpop.permute.xlu0 %53 }
 0x101   :  { %v61_v34 = vsel %vm60_vm3, %v59_v32, %v54_v33  ;;  %v85_v36 = vsel %vm56_vm1, %v74_v27, %v77_v31 }
 0x102   :  { %v88_v35 = vmul.f32 0.0625, %v61_v34 }
 0x104   :  { %v83_v37 = vpop.permute.xlu1 %82  ;;  %v80_v38 = vpop.permute.xlu0 %79  ;;  %v90_v41 = vmul.f32 %v88_v35, %v88_v35 }
 0x105   :  { %v86_v39 = vsel %vm58_vm2, %v85_v36, %v80_v38 }
 0x106   :  { %v87_v40 = vsel %vm60_vm3, %v86_v39, %v83_v37 }
 0x107   :  { %v89_v42 = vmul.f32 0.0625, %v87_v40 }
 0x109   :  { %v91_v43 = vsub.f32 %v89_v42, %v90_v41 }
 0x10b   :  { %v92_v44 = vmax.f32 %v91_v43, 0.0 }
 0x10d   :  { %v93_v45 = vadd.f32 1e-05, %v92_v44 }
 0x10f   :  { %120 = vrsqrt.f32 %v93_v45 }
 0x11c   :  { %v121_v50 = vpop.eup %120 }
 0x11d   :  { %v95_v51 = vmul.f32 %v121_v50, %v31_v48 }
 0x11f   :  { %v96_v53 = vmul.f32 %v95_v51, %v88_v35  ;;  %v102_v54 = vrot.slane %v95_v51, %v101_v49 }
 0x121   :  { %v97_v55 = vsub.f32 %v32_v52, %v96_v53  ;;  %v104_v56 = vmul.f32 %v102_v54, %v148_v0 }
 0x123   :  { %v109_v57 = vrot.slane %v97_v55, %v101_v49 }
 0x125   :  { %v111_v58 = vadd.f32 %v109_v57, %v104_v56 }
 0x127   :  { %112 = vst [vmem:[%s166_s3] sm:$0xf] %v111_v58 }

</bundles_post_ra>
